<compile_context>
chip_gen: v7x
topology: tpu7x:2x2x1
jax: 0.10.0
libtpu: 0.0.40
codegen_flags: <defaults>
</compile_context>

<pallas_src>
import functools

import jax
import jax.numpy as jnp
from jax.experimental import pallas as pl
from jax.experimental.pallas import tpu as pltpu


def _round_up(n, m):
    return (n + m - 1) // m * m


def _pad_axis(a, axis, new_size):
    pad_width = [(0, 0)] * a.ndim
    pad_width[axis] = (0, new_size - a.shape[axis])
    return jnp.pad(a, pad_width)


def _encoder_kernel(x_ref, w1_ref, b1_ref, w2_ref, b2_ref, w3_ref, b3_ref,
                    o_ref, halo_ref, *, K):
    """Fused 3x[Conv1d(same) + ReLU + MaxPool1d(2,2)] for one batch element.

    x_ref:   (1, T, C_in)           f32
    wX_ref:  (K, C_in_x, C_out_x)   bf16 (channel dims zero-padded to x128)
    bX_ref:  (1, C_out_x)           f32
    o_ref:   (1, T//8, C_out3_pad)  f32
    halo_ref: VMEM scratch (T + 2*(K//2), C_max) f32, reused by every layer to
              hold [zero halo | activation | zero halo] so no padded copy ever
              touches HBM.
    """
    pad = K // 2

    def conv_relu_pool(h, w_ref, b_ref):
        t, c_in = h.shape
        c_out = w_ref.shape[2]
        # Build zero halo + activation rows entirely inside VMEM.
        zrow = jnp.zeros((pad, c_in), jnp.float32)
        halo_ref[0:pad, 0:c_in] = zrow
        halo_ref[pad + t:pad + t + pad, 0:c_in] = zrow
        halo_ref[pad:pad + t, 0:c_in] = h
        # Conv1d as K shifted matmuls: bf16 MXU inputs, f32 accumulation.
        acc = jnp.zeros((t, c_out), jnp.float32)
        for k in range(K):
            lhs = halo_ref[k:k + t, 0:c_in].astype(jnp.bfloat16)
            acc += jnp.dot(lhs, w_ref[k], preferred_element_type=jnp.float32)
        acc = jnp.maximum(acc + b_ref[...], 0.0)          # bias + ReLU in f32
        # MaxPool1d(kernel=2, stride=2) over the time axis.
        return jnp.max(acc.reshape(t // 2, 2, c_out), axis=1)

    h = x_ref[0].astype(jnp.float32)        # (T,   C_in)
    h = conv_relu_pool(h, w1_ref, b1_ref)   # (T/2, C1p)  - stays in VMEM
    h = conv_relu_pool(h, w2_ref, b2_ref)   # (T/4, C2p)  - stays in VMEM
    h = conv_relu_pool(h, w3_ref, b3_ref)   # (T/8, C3p)
    o_ref[0] = h.astype(o_ref.dtype)        # lane-dense (multiple-of-128) store


def cnn_encoder(params, x):
    """x: (B, T, C_in) -> (B, out_channels, T//8), matching the PyTorch module."""
    B, T, c_in = x.shape
    w1, b1 = params["conv1"]
    w2, b2 = params["conv2"]
    w3, b3 = params["conv3"]
    K = w1.shape[0]
    assert K % 2 == 1, "PyTorch padding=K//2 keeps the length only for odd K"
    assert T % 8 == 0, "T must be divisible by 8 (three MaxPool(2,2) stages)"

    c1, c2, c3 = w1.shape[2], w2.shape[2], w3.shape[2]
    c1p, c2p, c3p = (_round_up(c, 128) for c in (c1, c2, c3))

    # Zero-pad channel dims to multiples of 128 (lane-dense matmuls & stores);
    # weights go to bf16 for the MXU, biases stay f32 for the epilogue.
    bf = jnp.bfloat16
    w1p = _pad_axis(w1, 2, c1p).astype(bf)
    b1p = _pad_axis(b1, 1, c1p).astype(jnp.float32)
    w2p = _pad_axis(_pad_axis(w2, 1, c1p), 2, c2p).astype(bf)
    b2p = _pad_axis(b2, 1, c2p).astype(jnp.float32)
    w3p = _pad_axis(_pad_axis(w3, 1, c2p), 2, c3p).astype(bf)
    b3p = _pad_axis(b3, 1, c3p).astype(jnp.float32)

    To = T // 8
    pad = K // 2
    c_max = max(c_in, c1p, c2p)
    kernel = functools.partial(_encoder_kernel, K=K)

    out = pl.pallas_call(
        kernel,
        out_shape=jax.ShapeDtypeStruct((B, To, c3p), jnp.float32),
        grid_spec=pltpu.PrefetchScalarGridSpec(
            num_scalar_prefetch=0,
            grid=(B,),
            in_specs=[
                pl.BlockSpec((1, T, c_in), lambda bi: (bi, 0, 0)),
                pl.BlockSpec((K, c_in, c1p), lambda bi: (0, 0, 0)),
                pl.BlockSpec((1, c1p), lambda bi: (0, 0)),
                pl.BlockSpec((K, c1p, c2p), lambda bi: (0, 0, 0)),
                pl.BlockSpec((1, c2p), lambda bi: (0, 0)),
                pl.BlockSpec((K, c2p, c3p), lambda bi: (0, 0, 0)),
                pl.BlockSpec((1, c3p), lambda bi: (0, 0)),
            ],
            out_specs=pl.BlockSpec((1, To, c3p), lambda bi: (bi, 0, 0)),
            scratch_shapes=[pltpu.VMEM((T + 2 * pad, c_max), jnp.float32)],
        ),
        compiler_params=pltpu.CompilerParams(
            dimension_semantics=("parallel",)),
    )(x.astype(jnp.float32), w1p, b1p, w2p, b2p, w3p, b3p)

    # Drop padded channels, back to PyTorch's NCW output layout.
    return jnp.transpose(out[:, :, :c3], (0, 2, 1))


def init_params(key, in_channels, out_channels, kernel_size):
    """Deterministic synthetic parameters (PyTorch-like uniform fan-in init)."""
    def conv_init(k, c_in, c_out, ksz):
        bound = 1.0 / jnp.sqrt(jnp.float32(c_in * ksz))
        kw, kb = jax.random.split(k)
        w = jax.random.uniform(kw, (ksz, c_in, c_out), jnp.float32, -bound, bound)
        b = jax.random.uniform(kb, (1, c_out), jnp.float32, -bound, bound)
        return w, b

    k1, k2, k3 = jax.random.split(key, 3)
    return {
        "conv1": conv_init(k1, in_channels, 128, kernel_size),
        "conv2": conv_init(k2, 128, 96, kernel_size),
        "conv3": conv_init(k3, 96, out_channels, kernel_size),
    }


def _reference(params, x):
    """Pure-JAX reference (lax conv) mirroring the kernel's bf16-in/f32-acc math."""
    def layer(h, w, b):
        y = jax.lax.conv_general_dilated(
            h.astype(jnp.bfloat16), w.astype(jnp.bfloat16),
            window_strides=(1,), padding="SAME",
            dimension_numbers=("NWC", "WIO", "NWC"),
            preferred_element_type=jnp.float32)
        y = jnp.maximum(y + b[None, :, :].astype(jnp.float32), 0.0)
        B, T, C = y.shape
        return jnp.max(y.reshape(B, T // 2, 2, C), axis=2)

    h = x
    for name in ("conv1", "conv2", "conv3"):
        h = layer(h, *params[name])
    return jnp.transpose(h, (0, 2, 1))


if __name__ == "__main__":
    in_channels, out_channels, kernel_size = 4, 32, 3
    B, T = 2, 16  # x: (B, T, in_channels), as the module's forward expects

    key = jax.random.PRNGKey(0)
    kx, kp = jax.random.split(key)
    x = jax.random.normal(kx, (B, T, in_channels), jnp.float32)
    params = init_params(kp, in_channels, out_channels, kernel_size)

    out = jax.block_until_ready(jax.jit(cnn_encoder)(params, x))
    ref = jax.block_until_ready(_reference(params, x))

    assert out.shape == (B, out_channels, T // 8), out.shape
    assert jnp.allclose(out, ref, atol=2e-3, rtol=2e-3), "mismatch vs reference"

    print("KERNEL_OK")
</pallas_src>

<mosaic_0001>
module attributes {stable_mosaic.version = 11 : i64} {
  func.func @_encoder_kernel(%arg0: i32, %arg1: memref<1x16x4xf32, #tpu.memory_space<vmem>>, %arg2: memref<3x4x128xbf16, #tpu.memory_space<vmem>>, %arg3: memref<1x128xf32, #tpu.memory_space<vmem>>, %arg4: memref<3x128x128xbf16, #tpu.memory_space<vmem>>, %arg5: memref<1x128xf32, #tpu.memory_space<vmem>>, %arg6: memref<3x128x128xbf16, #tpu.memory_space<vmem>>, %arg7: memref<1x128xf32, #tpu.memory_space<vmem>>, %arg8: memref<1x2x128xf32, #tpu.memory_space<vmem>>, %arg9: memref<18x128xf32, #tpu.memory_space<vmem>>) attributes {dimension_semantics = [#tpu.dimension_semantics<parallel>], iteration_bounds = array<i64: 2>, scalar_prefetch = 0 : i64, scratch_operands = 1 : i64, tpu.core_type = #tpu.core_type<tc>, window_params = [{transform_indices = @transform_0, window_bounds = array<i64: 1, 16, 4>}, {pipeline_mode = #tpu.pipeline_mode<synchronous>, transform_indices = @transform_1, window_bounds = array<i64: 3, 4, 128>}, {pipeline_mode = #tpu.pipeline_mode<synchronous>, transform_indices = @transform_2, window_bounds = array<i64: 1, 128>}, {pipeline_mode = #tpu.pipeline_mode<synchronous>, transform_indices = @transform_3, window_bounds = array<i64: 3, 128, 128>}, {pipeline_mode = #tpu.pipeline_mode<synchronous>, transform_indices = @transform_4, window_bounds = array<i64: 1, 128>}, {pipeline_mode = #tpu.pipeline_mode<synchronous>, transform_indices = @transform_5, window_bounds = array<i64: 3, 128, 128>}, {pipeline_mode = #tpu.pipeline_mode<synchronous>, transform_indices = @transform_6, window_bounds = array<i64: 1, 128>}, {transform_indices = @transform_7, window_bounds = array<i64: 1, 2, 128>}]} {
    %c0 = arith.constant 0 : index
    %c0_0 = arith.constant 0 : index
    %c0_1 = arith.constant 0 : index
    %0 = vector.load %arg1[%c0, %c0_0, %c0_1] : memref<1x16x4xf32, #tpu.memory_space<vmem>>, vector<1x16x4xf32>
    %1 = vector.shape_cast %0 : vector<1x16x4xf32> to vector<16x4xf32>
    %cst = arith.constant 0.000000e+00 : f32
    %2 = vector.broadcast %cst : f32 to vector<1x4xf32>
    %c0_2 = arith.constant 0 : index
    %c0_3 = arith.constant 0 : index
    %3 = vector.load %arg9[%c0_2, %c0_3] : memref<18x128xf32, #tpu.memory_space<vmem>>, vector<1x4xf32>
    tpu.vector_store %arg9[%c0_2, %c0_3], %2 {strides = array<i32>} : memref<18x128xf32, #tpu.memory_space<vmem>>, vector<1x4xf32>,
    %c17 = arith.constant 17 : index
    %c0_4 = arith.constant 0 : index
    %4 = vector.load %arg9[%c17, %c0_4] : memref<18x128xf32, #tpu.memory_space<vmem>>, vector<1x4xf32>
    tpu.vector_store %arg9[%c17, %c0_4], %2 {strides = array<i32>} : memref<18x128xf32, #tpu.memory_space<vmem>>, vector<1x4xf32>,
    %c1 = arith.constant 1 : index
    %c0_5 = arith.constant 0 : index
    %5 = vector.load %arg9[%c1, %c0_5] : memref<18x128xf32, #tpu.memory_space<vmem>>, vector<16x4xf32>
    tpu.vector_store %arg9[%c1, %c0_5], %1 {strides = array<i32>} : memref<18x128xf32, #tpu.memory_space<vmem>>, vector<16x4xf32>,
    %cst_6 = arith.constant 0.000000e+00 : f32
    %6 = vector.broadcast %cst_6 : f32 to vector<16x128xf32>
    %c0_7 = arith.constant 0 : index
    %c0_8 = arith.constant 0 : index
    %7 = vector.load %arg9[%c0_7, %c0_8] : memref<18x128xf32, #tpu.memory_space<vmem>>, vector<16x4xf32>
    %8 = arith.truncf %7 : vector<16x4xf32> to vector<16x4xbf16>
    %c0_9 = arith.constant 0 : index
    %c0_10 = arith.constant 0 : index
    %c0_11 = arith.constant 0 : index
    %9 = vector.load %arg2[%c0_9, %c0_10, %c0_11] : memref<3x4x128xbf16, #tpu.memory_space<vmem>>, vector<1x4x128xbf16>
    %10 = vector.shape_cast %9 : vector<1x4x128xbf16> to vector<4x128xbf16>
    %cst_12 = arith.constant dense<0.000000e+00> : vector<16x128xf32>
    %11 = tpu.matmul %8, %10, %cst_12 {dimension_numbers = #tpu.dot_dimension_numbers<[1], [0], [0], [1], [0, 0, 1, 1], [], []>} : vector<16x4xbf16>, vector<4x128xbf16>, vector<16x128xf32> -> vector<16x128xf32>
    %12 = arith.addf %6, %11 : vector<16x128xf32>
    %c1_13 = arith.constant 1 : index
    %c0_14 = arith.constant 0 : index
    %13 = vector.load %arg9[%c1_13, %c0_14] : memref<18x128xf32, #tpu.memory_space<vmem>>, vector<16x4xf32>
    %14 = arith.truncf %13 : vector<16x4xf32> to vector<16x4xbf16>
    %c1_15 = arith.constant 1 : index
    %c0_16 = arith.constant 0 : index
    %c0_17 = arith.constant 0 : index
    %15 = vector.load %arg2[%c1_15, %c0_16, %c0_17] : memref<3x4x128xbf16, #tpu.memory_space<vmem>>, vector<1x4x128xbf16>
    %16 = vector.shape_cast %15 : vector<1x4x128xbf16> to vector<4x128xbf16>
    %cst_18 = arith.constant dense<0.000000e+00> : vector<16x128xf32>
    %17 = tpu.matmul %14, %16, %cst_18 {dimension_numbers = #tpu.dot_dimension_numbers<[1], [0], [0], [1], [0, 0, 1, 1], [], []>} : vector<16x4xbf16>, vector<4x128xbf16>, vector<16x128xf32> -> vector<16x128xf32>
    %18 = arith.addf %12, %17 : vector<16x128xf32>
    %c2 = arith.constant 2 : index
    %c0_19 = arith.constant 0 : index
    %19 = vector.load %arg9[%c2, %c0_19] : memref<18x128xf32, #tpu.memory_space<vmem>>, vector<16x4xf32>
    %20 = arith.truncf %19 : vector<16x4xf32> to vector<16x4xbf16>
    %c2_20 = arith.constant 2 : index
    %c0_21 = arith.constant 0 : index
    %c0_22 = arith.constant 0 : index
    %21 = vector.load %arg2[%c2_20, %c0_21, %c0_22] : memref<3x4x128xbf16, #tpu.memory_space<vmem>>, vector<1x4x128xbf16>
    %22 = vector.shape_cast %21 : vector<1x4x128xbf16> to vector<4x128xbf16>
    %cst_23 = arith.constant dense<0.000000e+00> : vector<16x128xf32>
    %23 = tpu.matmul %20, %22, %cst_23 {dimension_numbers = #tpu.dot_dimension_numbers<[1], [0], [0], [1], [0, 0, 1, 1], [], []>} : vector<16x4xbf16>, vector<4x128xbf16>, vector<16x128xf32> -> vector<16x128xf32>
    %24 = arith.addf %18, %23 : vector<16x128xf32>
    %c0_24 = arith.constant 0 : index
    %c0_25 = arith.constant 0 : index
    %25 = vector.load %arg3[%c0_24, %c0_25] : memref<1x128xf32, #tpu.memory_space<vmem>>, vector<1x128xf32>
    %26 = vector.broadcast %25 : vector<1x128xf32> to vector<16x128xf32>
    %27 = arith.addf %24, %26 : vector<16x128xf32>
    %cst_26 = arith.constant 0.000000e+00 : f32
    %28 = vector.broadcast %cst_26 : f32 to vector<16x128xf32>
    %29 = arith.maximumf %27, %28 : vector<16x128xf32>
    %30 = vector.shape_cast %29 : vector<16x128xf32> to vector<8x2x128xf32>
    %cst_27 = arith.constant dense<0xFF800000> : vector<8x128xf32>
    %31 = vector.multi_reduction <maximumf>, %30, %cst_27 [1] : vector<8x2x128xf32> to vector<8x128xf32>
    %cst_28 = arith.constant 0.000000e+00 : f32
    %32 = vector.broadcast %cst_28 : f32 to vector<1x128xf32>
    %c0_29 = arith.constant 0 : index
    %c0_30 = arith.constant 0 : index
    %33 = vector.load %arg9[%c0_29, %c0_30] : memref<18x128xf32, #tpu.memory_space<vmem>>, vector<1x128xf32>
    tpu.vector_store %arg9[%c0_29, %c0_30], %32 {strides = array<i32>} : memref<18x128xf32, #tpu.memory_space<vmem>>, vector<1x128xf32>,
    %c9 = arith.constant 9 : index
    %c0_31 = arith.constant 0 : index
    %34 = vector.load %arg9[%c9, %c0_31] : memref<18x128xf32, #tpu.memory_space<vmem>>, vector<1x128xf32>
    tpu.vector_store %arg9[%c9, %c0_31], %32 {strides = array<i32>} : memref<18x128xf32, #tpu.memory_space<vmem>>, vector<1x128xf32>,
    %c1_32 = arith.constant 1 : index
    %c0_33 = arith.constant 0 : index
    %35 = vector.load %arg9[%c1_32, %c0_33] : memref<18x128xf32, #tpu.memory_space<vmem>>, vector<8x128xf32>
    tpu.vector_store %arg9[%c1_32, %c0_33], %31 {strides = array<i32>} : memref<18x128xf32, #tpu.memory_space<vmem>>, vector<8x128xf32>,
    %cst_34 = arith.constant 0.000000e+00 : f32
    %36 = vector.broadcast %cst_34 : f32 to vector<8x128xf32>
    %c0_35 = arith.constant 0 : index
    %c0_36 = arith.constant 0 : index
    %37 = vector.load %arg9[%c0_35, %c0_36] : memref<18x128xf32, #tpu.memory_space<vmem>>, vector<8x128xf32>
    %38 = arith.truncf %37 : vector<8x128xf32> to vector<8x128xbf16>
    %c0_37 = arith.constant 0 : index
    %c0_38 = arith.constant 0 : index
    %c0_39 = arith.constant 0 : index
    %39 = vector.load %arg4[%c0_37, %c0_38, %c0_39] : memref<3x128x128xbf16, #tpu.memory_space<vmem>>, vector<1x128x128xbf16>
    %40 = vector.shape_cast %39 : vector<1x128x128xbf16> to vector<128x128xbf16>
    %cst_40 = arith.constant dense<0.000000e+00> : vector<8x128xf32>
    %41 = tpu.matmul %38, %40, %cst_40 {dimension_numbers = #tpu.dot_dimension_numbers<[1], [0], [0], [1], [0, 0, 1, 1], [], []>} : vector<8x128xbf16>, vector<128x128xbf16>, vector<8x128xf32> -> vector<8x128xf32>
    %42 = arith.addf %36, %41 : vector<8x128xf32>
    %c1_41 = arith.constant 1 : index
    %c0_42 = arith.constant 0 : index
    %43 = vector.load %arg9[%c1_41, %c0_42] : memref<18x128xf32, #tpu.memory_space<vmem>>, vector<8x128xf32>
    %44 = arith.truncf %43 : vector<8x128xf32> to vector<8x128xbf16>
    %c1_43 = arith.constant 1 : index
    %c0_44 = arith.constant 0 : index
    %c0_45 = arith.constant 0 : index
    %45 = vector.load %arg4[%c1_43, %c0_44, %c0_45] : memref<3x128x128xbf16, #tpu.memory_space<vmem>>, vector<1x128x128xbf16>
    %46 = vector.shape_cast %45 : vector<1x128x128xbf16> to vector<128x128xbf16>
    %cst_46 = arith.constant dense<0.000000e+00> : vector<8x128xf32>
    %47 = tpu.matmul %44, %46, %cst_46 {dimension_numbers = #tpu.dot_dimension_numbers<[1], [0], [0], [1], [0, 0, 1, 1], [], []>} : vector<8x128xbf16>, vector<128x128xbf16>, vector<8x128xf32> -> vector<8x128xf32>
    %48 = arith.addf %42, %47 : vector<8x128xf32>
    %c2_47 = arith.constant 2 : index
    %c0_48 = arith.constant 0 : index
    %49 = vector.load %arg9[%c2_47, %c0_48] : memref<18x128xf32, #tpu.memory_space<vmem>>, vector<8x128xf32>
    %50 = arith.truncf %49 : vector<8x128xf32> to vector<8x128xbf16>
    %c2_49 = arith.constant 2 : index
    %c0_50 = arith.constant 0 : index
    %c0_51 = arith.constant 0 : index
    %51 = vector.load %arg4[%c2_49, %c0_50, %c0_51] : memref<3x128x128xbf16, #tpu.memory_space<vmem>>, vector<1x128x128xbf16>
    %52 = vector.shape_cast %51 : vector<1x128x128xbf16> to vector<128x128xbf16>
    %cst_52 = arith.constant dense<0.000000e+00> : vector<8x128xf32>
    %53 = tpu.matmul %50, %52, %cst_52 {dimension_numbers = #tpu.dot_dimension_numbers<[1], [0], [0], [1], [0, 0, 1, 1], [], []>} : vector<8x128xbf16>, vector<128x128xbf16>, vector<8x128xf32> -> vector<8x128xf32>
    %54 = arith.addf %48, %53 : vector<8x128xf32>
    %c0_53 = arith.constant 0 : index
    %c0_54 = arith.constant 0 : index
    %55 = vector.load %arg5[%c0_53, %c0_54] : memref<1x128xf32, #tpu.memory_space<vmem>>, vector<1x128xf32>
    %56 = vector.broadcast %55 : vector<1x128xf32> to vector<8x128xf32>
    %57 = arith.addf %54, %56 : vector<8x128xf32>
    %cst_55 = arith.constant 0.000000e+00 : f32
    %58 = vector.broadcast %cst_55 : f32 to vector<8x128xf32>
    %59 = arith.maximumf %57, %58 : vector<8x128xf32>
    %60 = vector.shape_cast %59 : vector<8x128xf32> to vector<4x2x128xf32>
    %cst_56 = arith.constant dense<0xFF800000> : vector<4x128xf32>
    %61 = vector.multi_reduction <maximumf>, %60, %cst_56 [1] : vector<4x2x128xf32> to vector<4x128xf32>
    %cst_57 = arith.constant 0.000000e+00 : f32
    %62 = vector.broadcast %cst_57 : f32 to vector<1x128xf32>
    %c0_58 = arith.constant 0 : index
    %c0_59 = arith.constant 0 : index
    %63 = vector.load %arg9[%c0_58, %c0_59] : memref<18x128xf32, #tpu.memory_space<vmem>>, vector<1x128xf32>
    tpu.vector_store %arg9[%c0_58, %c0_59], %62 {strides = array<i32>} : memref<18x128xf32, #tpu.memory_space<vmem>>, vector<1x128xf32>,
    %c5 = arith.constant 5 : index
    %c0_60 = arith.constant 0 : index
    %64 = vector.load %arg9[%c5, %c0_60] : memref<18x128xf32, #tpu.memory_space<vmem>>, vector<1x128xf32>
    tpu.vector_store %arg9[%c5, %c0_60], %62 {strides = array<i32>} : memref<18x128xf32, #tpu.memory_space<vmem>>, vector<1x128xf32>,
    %c1_61 = arith.constant 1 : index
    %c0_62 = arith.constant 0 : index
    %65 = vector.load %arg9[%c1_61, %c0_62] : memref<18x128xf32, #tpu.memory_space<vmem>>, vector<4x128xf32>
    tpu.vector_store %arg9[%c1_61, %c0_62], %61 {strides = array<i32>} : memref<18x128xf32, #tpu.memory_space<vmem>>, vector<4x128xf32>,
    %cst_63 = arith.constant 0.000000e+00 : f32
    %66 = vector.broadcast %cst_63 : f32 to vector<4x128xf32>
    %c0_64 = arith.constant 0 : index
    %c0_65 = arith.constant 0 : index
    %67 = vector.load %arg9[%c0_64, %c0_65] : memref<18x128xf32, #tpu.memory_space<vmem>>, vector<4x128xf32>
    %68 = arith.truncf %67 : vector<4x128xf32> to vector<4x128xbf16>
    %c0_66 = arith.constant 0 : index
    %c0_67 = arith.constant 0 : index
    %c0_68 = arith.constant 0 : index
    %69 = vector.load %arg6[%c0_66, %c0_67, %c0_68] : memref<3x128x128xbf16, #tpu.memory_space<vmem>>, vector<1x128x128xbf16>
    %70 = vector.shape_cast %69 : vector<1x128x128xbf16> to vector<128x128xbf16>
    %cst_69 = arith.constant dense<0.000000e+00> : vector<4x128xf32>
    %71 = tpu.matmul %68, %70, %cst_69 {dimension_numbers = #tpu.dot_dimension_numbers<[1], [0], [0], [1], [0, 0, 1, 1], [], []>} : vector<4x128xbf16>, vector<128x128xbf16>, vector<4x128xf32> -> vector<4x128xf32>
    %72 = arith.addf %66, %71 : vector<4x128xf32>
    %c1_70 = arith.constant 1 : index
    %c0_71 = arith.constant 0 : index
    %73 = vector.load %arg9[%c1_70, %c0_71] : memref<18x128xf32, #tpu.memory_space<vmem>>, vector<4x128xf32>
    %74 = arith.truncf %73 : vector<4x128xf32> to vector<4x128xbf16>
    %c1_72 = arith.constant 1 : index
    %c0_73 = arith.constant 0 : index
    %c0_74 = arith.constant 0 : index
    %75 = vector.load %arg6[%c1_72, %c0_73, %c0_74] : memref<3x128x128xbf16, #tpu.memory_space<vmem>>, vector<1x128x128xbf16>
    %76 = vector.shape_cast %75 : vector<1x128x128xbf16> to vector<128x128xbf16>
    %cst_75 = arith.constant dense<0.000000e+00> : vector<4x128xf32>
    %77 = tpu.matmul %74, %76, %cst_75 {dimension_numbers = #tpu.dot_dimension_numbers<[1], [0], [0], [1], [0, 0, 1, 1], [], []>} : vector<4x128xbf16>, vector<128x128xbf16>, vector<4x128xf32> -> vector<4x128xf32>
    %78 = arith.addf %72, %77 : vector<4x128xf32>
    %c2_76 = arith.constant 2 : index
    %c0_77 = arith.constant 0 : index
    %79 = vector.load %arg9[%c2_76, %c0_77] : memref<18x128xf32, #tpu.memory_space<vmem>>, vector<4x128xf32>
    %80 = arith.truncf %79 : vector<4x128xf32> to vector<4x128xbf16>
    %c2_78 = arith.constant 2 : index
    %c0_79 = arith.constant 0 : index
    %c0_80 = arith.constant 0 : index
    %81 = vector.load %arg6[%c2_78, %c0_79, %c0_80] : memref<3x128x128xbf16, #tpu.memory_space<vmem>>, vector<1x128x128xbf16>
    %82 = vector.shape_cast %81 : vector<1x128x128xbf16> to vector<128x128xbf16>
    %cst_81 = arith.constant dense<0.000000e+00> : vector<4x128xf32>
    %83 = tpu.matmul %80, %82, %cst_81 {dimension_numbers = #tpu.dot_dimension_numbers<[1], [0], [0], [1], [0, 0, 1, 1], [], []>} : vector<4x128xbf16>, vector<128x128xbf16>, vector<4x128xf32> -> vector<4x128xf32>
    %84 = arith.addf %78, %83 : vector<4x128xf32>
    %c0_82 = arith.constant 0 : index
    %c0_83 = arith.constant 0 : index
    %85 = vector.load %arg7[%c0_82, %c0_83] : memref<1x128xf32, #tpu.memory_space<vmem>>, vector<1x128xf32>
    %86 = vector.broadcast %85 : vector<1x128xf32> to vector<4x128xf32>
    %87 = arith.addf %84, %86 : vector<4x128xf32>
    %cst_84 = arith.constant 0.000000e+00 : f32
    %88 = vector.broadcast %cst_84 : f32 to vector<4x128xf32>
    %89 = arith.maximumf %87, %88 : vector<4x128xf32>
    %90 = vector.shape_cast %89 : vector<4x128xf32> to vector<2x2x128xf32>
    %cst_85 = arith.constant dense<0xFF800000> : vector<2x128xf32>
    %91 = vector.multi_reduction <maximumf>, %90, %cst_85 [1] : vector<2x2x128xf32> to vector<2x128xf32>
    %c0_86 = arith.constant 0 : index
    %c0_87 = arith.constant 0 : index
    %c0_88 = arith.constant 0 : index
    %92 = vector.load %arg8[%c0_86, %c0_87, %c0_88] : memref<1x2x128xf32, #tpu.memory_space<vmem>>, vector<1x2x128xf32>
    %93 = vector.shape_cast %92 : vector<1x2x128xf32> to vector<2x128xf32>
    %94 = vector.shape_cast %91 : vector<2x128xf32> to vector<1x2x128xf32>
    tpu.vector_store %arg8[%c0_86, %c0_87, %c0_88], %94 {strides = array<i32>} : memref<1x2x128xf32, #tpu.memory_space<vmem>>, vector<1x2x128xf32>,
    return
  }
  func.func @transform_0(%arg0: i32) -> (i32, i32, i32) {
    %c0_i32 = arith.constant 0 : i32
    %c0_i32_0 = arith.constant 0 : i32
    %c0_i32_1 = arith.constant 0 : i32
    return %arg0, %c0_i32, %c0_i32_0 : i32, i32, i32
  }
  func.func @transform_1(%arg0: i32) -> (i32, i32, i32) {
    %c0_i32 = arith.constant 0 : i32
    %c0_i32_0 = arith.constant 0 : i32
    %c0_i32_1 = arith.constant 0 : i32
    %c0_i32_2 = arith.constant 0 : i32
    return %c0_i32, %c0_i32_0, %c0_i32_1 : i32, i32, i32
  }
  func.func @transform_2(%arg0: i32) -> (i32, i32) {
    %c0_i32 = arith.constant 0 : i32
    %c0_i32_0 = arith.constant 0 : i32
    %c0_i32_1 = arith.constant 0 : i32
    return %c0_i32, %c0_i32_0 : i32, i32
  }
  func.func @transform_3(%arg0: i32) -> (i32, i32, i32) {
    %c0_i32 = arith.constant 0 : i32
    %c0_i32_0 = arith.constant 0 : i32
    %c0_i32_1 = arith.constant 0 : i32
    %c0_i32_2 = arith.constant 0 : i32
    return %c0_i32, %c0_i32_0, %c0_i32_1 : i32, i32, i32
  }
  func.func @transform_4(%arg0: i32) -> (i32, i32) {
    %c0_i32 = arith.constant 0 : i32
    %c0_i32_0 = arith.constant 0 : i32
    %c0_i32_1 = arith.constant 0 : i32
    return %c0_i32, %c0_i32_0 : i32, i32
  }
  func.func @transform_5(%arg0: i32) -> (i32, i32, i32) {
    %c0_i32 = arith.constant 0 : i32
    %c0_i32_0 = arith.constant 0 : i32
    %c0_i32_1 = arith.constant 0 : i32
    %c0_i32_2 = arith.constant 0 : i32
    return %c0_i32, %c0_i32_0, %c0_i32_1 : i32, i32, i32
  }
  func.func @transform_6(%arg0: i32) -> (i32, i32) {
    %c0_i32 = arith.constant 0 : i32
    %c0_i32_0 = arith.constant 0 : i32
    %c0_i32_1 = arith.constant 0 : i32
    return %c0_i32, %c0_i32_0 : i32, i32
  }
  func.func @transform_7(%arg0: i32) -> (i32, i32, i32) {
    %c0_i32 = arith.constant 0 : i32
    %c0_i32_0 = arith.constant 0 : i32
    %c0_i32_1 = arith.constant 0 : i32
    return %arg0, %c0_i32, %c0_i32_0 : i32, i32, i32
  }
}

</mosaic_0001>

<bundles_post_ra>
// kernel: cnn_encoder.1
= control target key start
LH: loop header
LB: loop body
LE: loop exit
PB: predicated region body
PF: predicated region fallthrough
CT: control target
= control target key end

     0   :  { %s1824_s24 = smov 0   ;;  %s2120_s0 = inlined_call_operand.vmem [shape: f32[2,16,4], index: 0, kind: input, shape index: {}]   ;;  %s2121_s1 = inlined_call_operand.vmem [shape: bf16[3,4,128], index: 1, kind: input, shape index: {}]   ;;  %s2122_s2 = inlined_call_operand.vmem [shape: f32[1,128], index: 2, kind: input, shape index: {}]   ;;  %s2123_s3 = inlined_call_operand.vmem [shape: bf16[3,128,128], index: 3, kind: input, shape index: {}]   ;;  %s2124_s4 = inlined_call_operand.vmem [shape: f32[1,128], index: 4, kind: input, shape index: {}]   ;;  %s2125_s5 = inlined_call_operand.vmem [shape: bf16[3,128,128], index: 5, kind: input, shape index: {}]   ;;  %s2126_s6 = inlined_call_operand.vmem [shape: f32[1,128], index: 6, kind: input, shape index: {}]   ;;  %s2127_s7 = inlined_call_operand.vmem [shape: f32[2,2,128], index: 7, kind: output, shape index: {}]  }
   0x1 LB: > { %s1385_s25 = sadd.s32 4294967295, %s1779_s24   ;;  %p1389_p0 = scmp.ge.s32.totalorder %s1779_s24, 1  ;;  %s1779_s24 = sphi %s1824_s24, %s17_s24  }
   0x2   : > { %p237_p1 = scmp.lt.s32.totalorder %s1779_s24, 3 }
   0x4   : > { %p238_p2 = pnand %p1389_p0, %p237_p1 }
   0x5   : > { %v1393_v0 = vld [vmem:[%s2121_s1 + $0x2] sm:$0x3] (!%p238_p2)  ;;  %vm298_vm0 = vcmask (!%p238_p2), 1041408   ;;  %v289_v1 = vld [vmem:[%s2121_s1] sm:$0x3] (!%p238_p2)  ;;  %v1781_v2 = vmov (!%p238_p2), 0.0   ;;  %v461_v44 = vlaneseq (!%p238_p2) }
   0x6   : > { %241 = sbr.rel (%p238_p2) target bundleno = 829 (0x33d), region = 48  ;;  %1576 = vmatprep.subr.bf16.mxu0 (!%p238_p2), %v1781_v2  ;;  %v300_v3 = vsel (!%p238_p2), %vm298_vm0, %v1393_v0, 0  ;;  %1582 = vmatprep.subr.bf16.mxu1 (!%p238_p2), %v1781_v2  ;;  %v347_v4 = vsel (!%p238_p2), %vm298_vm0, %v289_v1, 0  ;;  %p268_p3 = scmp.lt.s32.totalorder (!%p238_p2), %s1385_s25, 1  ;;  %vm280_vm1 = vcmask (!%p238_p2), 24576   ;;  %vm1782_vm2 = vmmov (!%p238_p2), 0  }
   0x7   : > { %1577 = vmatpush3.bf16.msra.mxu0 (!%p238_p2), %v300_v3  ;;  %1583 = vmatpush3.bf16.msra.mxu1 (!%p238_p2), %v347_v4  ;;  %281 = vst.msk [vmem:[#allocation2] sm:$0x1] (!%p238_p2), %vm280_vm1, %v1781_v2  ;;  %282 = vst.msk [vmem:[#allocation2 + $0x11] sm:$0x1] (!%p238_p2), %vm280_vm1, %v1781_v2  ;;  %vm283_vm3 = vcmask (!%p238_p2), 31744   ;;  %v1725_v18 = vld [vmem:[%s2123_s3 + $0x40] sm:$0xff] (!%p238_p2)  }
   0x8   : > { %1578 = vmatprep.mubr.msk.bf16.mxu0 (!%p238_p2), %vm1782_vm2, %v1781_v2  ;;  %1584 = vmatprep.mubr.msk.bf16.mxu1 (!%p238_p2), %vm1782_vm2, %v1781_v2  ;;  %v1396_v7 = vld [vmem:[%s2121_s1 + $0x4] sm:$0x3] (!%p238_p2)  ;;  %v1727_v19 = vld [vmem:[%s2123_s3 + $0x48] sm:$0xff] (!%p238_p2)   ;;  %v1729_v20 = vld [vmem:[%s2123_s3 + $0x50] sm:$0xff] (!%p238_p2)   ;;  %v1783_v42 = vmov (!%p238_p2), 1983009808  }
   0x9   : > { %1588 = vmatprep.subr.bf16.mxu0 (!%p238_p2), %v1781_v2  ;;  %1594 = vmatprep.subr.bf16.mxu1 (!%p238_p2), %v1781_v2  ;;  %v399_v14 = vsel (!%p238_p2), %vm298_vm0, %v1396_v7, 0  ;;  %v1726_v21 = vld [vmem:[%s2123_s3] sm:$0xff] (!%p238_p2)   ;;  %v1731_v22 = vld [vmem:[%s2123_s3 + $0x58] sm:$0xff] (!%p238_p2)   ;;  %v1728_v23 = vld [vmem:[%s2123_s3 + $0x8] sm:$0xff] (!%p238_p2)   ;;  %v459_v43 = vunpack.c.l.s4 (!%p238_p2), %v1783_v42  ;;  %v462_v48 = vshrl.u32 (!%p238_p2), %v461_v44, 7  ;;  %vm565_vm4 = vcmask (!%p238_p2), 1041409  }
   0xa   : > { %v1733_v24 = vld [vmem:[%s2123_s3 + $0x60] sm:$0xff] (!%p238_p2)   ;;  %v1730_v25 = vld [vmem:[%s2123_s3 + $0x10] sm:$0xff] (!%p238_p2)   ;;  %v1735_v26 = vld [vmem:[%s2123_s3 + $0x68] sm:$0xff] (!%p238_p2)   ;;  %vm567_vm5 = vcmask (!%p238_p2), 1042434   ;;  %vm569_vm6 = vcmask (!%p238_p2), 1043459   ;;  %vm571_vm7 = vcmask (!%p238_p2), 1044484  }
   0xb   : > { %v1732_v27 = vld [vmem:[%s2123_s3 + $0x18] sm:$0xff] (!%p238_p2)   ;;  %v1737_v28 = vld [vmem:[%s2123_s3 + $0x70] sm:$0xff] (!%p238_p2)   ;;  %v1734_v29 = vld [vmem:[%s2123_s3 + $0x20] sm:$0xff] (!%p238_p2)   ;;  %v460_v47 = vunpack.c.0.s8 (!%p238_p2), %v459_v43  ;;  %vm573_vm8 = vcmask (!%p238_p2), 1045509   ;;  %vm575_vm9 = vcmask (!%p238_p2), 1046534   ;;  %vm577_vm10 = vcmask (!%p238_p2), 1047559  }
   0xc   : > { %v1739_v30 = vld [vmem:[%s2123_s3 + $0x78] sm:$0xff] (!%p238_p2)   ;;  %v1736_v31 = vld [vmem:[%s2123_s3 + $0x28] sm:$0xff] (!%p238_p2)   ;;  %v1738_v32 = vld [vmem:[%s2123_s3 + $0x30] sm:$0xff] (!%p238_p2)  }
   0xd   : > { %s2129_s25 = smov (!%p268_p3, %s1385_s25), 1  ;;  %v1740_v33 = vld [vmem:[%s2123_s3 + $0x38] sm:$0xff]   ;;  %v1398_v50 = vld [vmem:[%s2122_s2] ss:$0 sm:$0xff]  ;;  %v1941_v55 = vsub.s32 %v460_v47, %v462_v48 }
   0xe   : > { %s1515_s30 = sshll.u32 %s2129_s25, 4 }
   0xf   : > { %s272_s10 = scalar_lea.vmem %s2120_s0, %s1515_s30 }
  0x10   : > { %v278_v5 = vld [vmem:[%s272_s10] sm:$0xff]  ;;  %v279_v6 = vld [vmem:[%s272_s10 + $0x8] sm:$0xff]  ;;  %s1392_s10 = sshll.u32 %s2129_s25, 1 }
  0x11   : > { %284 = vst.msk [vmem:[#allocation2 + $0x1] sm:$0xff] %vm283_vm3, %v278_v5  ;;  %285 = vst.msk [vmem:[#allocation2 + $0x9] sm:$0xff] %vm283_vm3, %v279_v6  ;;  %s276_s13 = scalar_lea.vmem %s2127_s7, %s1392_s10 }
  0x18   : > { %v290_v8 = vld [vmem:[#allocation2 + $0x1] sm:$0xff]  ;;  %v291_v9 = vld [vmem:[#allocation2 + $0x9] sm:$0xff] }
  0x19   : > { %v286_v10 = vld [vmem:[#allocation2] sm:$0xff]  ;;  %v292_v11 = vpack.c.bf16 %v291_v9, %v290_v8  ;;  %v287_v12 = vld [vmem:[#allocation2 + $0x8] sm:$0xff] }
  0x1a   : > { %v390_v13 = vld [vmem:[#allocation2 + $0x2] sm:$0xff]  ;;  %555 = vst [vmem:[#allocation2] sm:$0x1] %v1781_v2  ;;  %v288_v15 = vpack.c.bf16 %v287_v12, %v286_v10  ;;  %v391_v16 = vld [vmem:[#allocation2 + $0xa] sm:$0xff] }
  0x1b   : > { %556 = vst [vmem:[#allocation2 + $0x9] sm:$0x1] %v1781_v2  ;;  %1579 = vmatmul.mubr.msk.bf16.vlgmr.msra.gmra.mrb[0].mxu0 %vm283_vm3, %v292_v11  ;;  %v392_v17 = vpack.c.bf16 %v391_v16, %v390_v13 }
  0x1c   : > { %1585 = vmatmul.mubr.msk.bf16.vlgmr.msra.gmra.mrb[0].mxu1 %vm283_vm3, %v288_v15  ;;  %1589 = vmatpush3.bf16.msra.mxu0 %v399_v14 }
  0x1d   : > { %1590 = vmatprep.mubr.msk.bf16.mxu0 %vm1782_vm2, %v1781_v2  ;;  %1614 = vmatprep.subr.bf16.mxu0 %v1781_v2 }
  0x1e   : > { %1610 = vmatprep.mubr.msk.bf16.mxu1 %vm1782_vm2, %v1781_v2  ;;  %1595 = vmatpush3.bf16.msra.mxu1 %v1725_v18 }
  0x1f   : > { %1596 = vmatprep.subr.bf16.mxu1 %v1781_v2 }
  0x22   : > { %1597 = vmatpush3.bf16.msra.mxu1 %v1727_v19 }
  0x23   : > { %1591 = vmatmul.mubr.msk.bf16.vlgmr.msra.gmra.mrb[4].mxu0 %vm283_vm3, %v392_v17  ;;  %1598 = vmatprep.subr.bf16.mxu1 %v1781_v2 }
  0x24   : > { %1630 = vmatprep.mubr.msk.bf16.mxu0 %vm1782_vm2, %v1781_v2  ;;  %1615 = vmatpush3.bf16.msra.mxu0 %v1726_v21 }
  0x25   : > { %1616 = vmatprep.subr.bf16.mxu0 %v1781_v2 }
  0x26   : > { %1599 = vmatpush3.bf16.msra.mxu1 %v1729_v20 }
  0x27   : > { %1600 = vmatprep.subr.bf16.mxu1 %v1781_v2 }
  0x28   : > { %1617 = vmatpush3.bf16.msra.mxu0 %v1728_v23 }
  0x29   : > { %1618 = vmatprep.subr.bf16.mxu0 %v1781_v2 }
  0x2a   : > { %1601 = vmatpush3.bf16.msra.mxu1 %v1731_v22 }
  0x2b   : > { %1602 = vmatprep.subr.bf16.mxu1 %v1781_v2 }
  0x2c   : > { %1619 = vmatpush3.bf16.msra.mxu0 %v1730_v25 }
  0x2d   : > { %1620 = vmatprep.subr.bf16.mxu0 %v1781_v2 }
  0x2e   : > { %1603 = vmatpush3.bf16.msra.mxu1 %v1733_v24 }
  0x2f   : > { %1604 = vmatprep.subr.bf16.mxu1 %v1781_v2 }
  0x30   : > { %1621 = vmatpush3.bf16.msra.mxu0 %v1732_v27 }
  0x31   : > { %1622 = vmatprep.subr.bf16.mxu0 %v1781_v2 }
  0x32   : > { %1605 = vmatpush3.bf16.msra.mxu1 %v1735_v26 }
  0x33   : > { %1606 = vmatprep.subr.bf16.mxu1 %v1781_v2 }
  0x34   : > { %1623 = vmatpush3.bf16.msra.mxu0 %v1734_v29 }
  0x35   : > { %1624 = vmatprep.subr.bf16.mxu0 %v1781_v2 }
  0x36   : > { %1607 = vmatpush3.bf16.msra.mxu1 %v1737_v28 }
  0x37   : > { %1608 = vmatprep.subr.bf16.mxu1 %v1781_v2 }
  0x38   : > { %1625 = vmatpush3.bf16.msra.mxu0 %v1736_v31 }
  0x39   : > { %1626 = vmatprep.subr.bf16.mxu0 %v1781_v2 }
  0x3a   : > { %1609 = vmatpush3.bf16.msra.mxu1 %v1739_v30 }
  0x3b   : > { %1634 = vmatprep.subr.bf16.mxu1 %v1781_v2 }
  0x3c   : > { %1627 = vmatpush3.bf16.msra.mxu0 %v1738_v32 }
  0x3d   : > { %1628 = vmatprep.subr.bf16.mxu0 %v1781_v2 }
  0x40   : > { %1629 = vmatpush3.bf16.msra.mxu0 %v1740_v33 }
  0x41   : > { %1654 = vmatprep.subr.bf16.mxu0 %v1781_v2 }
  0xee   : > { %v336_v34 = vpop.f32.mrb[0].mxu0 }
  0xef   : > { %v383_v35 = vpop.f32.mrb[0].mxu1  ;;  %v1580_v36 = vpop.f32.mrb[1].mxu0 }
  0xf0   : > { %v384_v37 = vadd.f32 %v383_v35, %v336_v34  ;;  %v1586_v38 = vpop.f32.mrb[1].mxu1  ;;  %v339_v39 = vpop.f32.mrb[2].mxu0 }
  0xf1   : > { %v386_v40 = vpop.f32.mrb[2].mxu1  ;;  %v1581_v41 = vpop.f32.mrb[3].mxu0 }
  0xf2   : > { %v387_v45 = vadd.f32 %v386_v40, %v339_v39  ;;  %v1587_v46 = vpop.f32.mrb[3].mxu1 }
  0xf6   : > { %v435_v49 = vpop.f32.mrb[4].mxu0 }
  0xf7   : > { %v442_v51 = vadd.f32 %v435_v49, %v384_v37  ;;  %v1592_v52 = vpop.f32.mrb[5].mxu0 }
  0xf8   : > { %v438_v53 = vpop.f32.mrb[6].mxu0 }
  0xf9   : > { %v451_v54 = vadd.f32 %v1398_v50, %v442_v51  ;;  %v443_v56 = vadd.f32 %v438_v53, %v387_v45  ;;  %v1593_v57 = vpop.f32.mrb[7].mxu0 }
  0xfb   : > { %v453_v58 = vmax.f32 %v451_v54, 0.0  ;;  %v452_v59 = vadd.f32 %v1398_v50, %v443_v56 }
  0xfd   : > { %v457_v60 = vcombine.high %v453_v58, %v453_v58  ;;  %v464_v61 = vrot.slane %v453_v58, %v1941_v55  ;;  %v454_v62 = vmax.f32 %v452_v59, 0.0 }
  0xff   : > { %v471_v63 = vrot.slane %v457_v60, %v1941_v55  ;;  %v472_v0 = vcombine.high %v464_v61, %v464_v61  ;;  %v499_v1 = vsel %vm298_vm0, %v464_v61, -inf  ;;  %v474_v3 = vcombine.high %v454_v62, %v454_v62 }
 0x100   : > { %v500_v4 = vrot.slane %v499_v1, 4  ;;  %v481_v5 = vrot.slane %v454_v62, %v1941_v55 }
 0x101   : > { %v473_v6 = vcombine.high %v471_v63, %v471_v63  ;;  %v506_v7 = vsel %vm298_vm0, %v472_v0, -inf  ;;  %v513_v8 = vsel %vm298_vm0, %v471_v63, -inf  ;;  %v488_v9 = vrot.slane %v474_v3, %v1941_v55 }
 0x102   : > { %v501_v10 = vmax.f32 %v499_v1, %v500_v4  ;;  %v507_v11 = vrot.slane %v506_v7, 4  ;;  %v514_v12 = vrot.slane %v513_v8, 4  ;;  %v489_v13 = vcombine.high %v481_v5, %v481_v5 }
 0x103   : > { %v520_v14 = vsel %vm298_vm0, %v473_v6, -inf  ;;  %v490_v15 = vcombine.high %v488_v9, %v488_v9  ;;  %v527_v16 = vsel %vm298_vm0, %v481_v5, -inf  ;;  %v541_v17 = vsel %vm298_vm0, %v488_v9, -inf  ;;  %v1741_v9 = vld [vmem:[%s2123_s3 + $0x80] sm:$0xff]  }
 0x104   : > { %v502_v18 = vrot.slane %v501_v10, 2  ;;  %v508_v19 = vmax.f32 %v506_v7, %v507_v11  ;;  %v515_v20 = vmax.f32 %v513_v8, %v514_v12  ;;  %v521_v21 = vrot.slane %v520_v14, 4  ;;  %v1742_v11 = vld [vmem:[%s2123_s3 + $0x88] sm:$0xff]  }
 0x105   : > { %v528_v22 = vrot.slane %v527_v16, 4  ;;  %v534_v23 = vsel %vm298_vm0, %v489_v13, -inf  ;;  %v542_v24 = vrot.slane %v541_v17, 4  ;;  %v548_v25 = vsel %vm298_vm0, %v490_v15, -inf  ;;  %v1743_v13 = vld [vmem:[%s2123_s3 + $0x90] sm:$0xff]  }
 0x106   : > { %v503_v26 = vmax.f32 %v501_v10, %v502_v18  ;;  %v509_v27 = vrot.slane %v508_v19, 2  ;;  %v516_v28 = vrot.slane %v515_v20, 2  ;;  %v522_v29 = vmax.f32 %v520_v14, %v521_v21  ;;  %v1746_v18 = vld [vmem:[%s2123_s3 + $0xa8] sm:$0xff]  }
 0x107   : > { %v529_v30 = vmax.f32 %v527_v16, %v528_v22  ;;  %v535_v31 = vrot.slane %v534_v23, 4  ;;  %v543_v32 = vmax.f32 %v541_v17, %v542_v24  ;;  %v549_v33 = vrot.slane %v548_v25, 4  ;;  %v1744_v16 = vld [vmem:[%s2123_s3 + $0x98] sm:$0xff]   ;;  %v1745_v17 = vld [vmem:[%s2123_s3 + $0xa0] sm:$0xff]   ;;  %v1751_v24 = vld [vmem:[%s2125_s5 + $0x48] sm:$0xff]  }
 0x108   : > { %v504_v34 = vrot.slane %v503_v26, 1  ;;  %v510_v35 = vmax.f32 %v508_v19, %v509_v27  ;;  %v517_v36 = vmax.f32 %v515_v20, %v516_v28  ;;  %v523_v37 = vrot.slane %v522_v29, 2  ;;  %v1747_v19 = vld [vmem:[%s2123_s3 + $0xb0] sm:$0xff]   ;;  %v1748_v20 = vld [vmem:[%s2123_s3 + $0xb8] sm:$0xff]   ;;  %v1749_v22 = vld [vmem:[%s2125_s5 + $0x40] sm:$0xff]  }
 0x109   : > { %v530_v38 = vrot.slane %v529_v30, 2  ;;  %v536_v39 = vmax.f32 %v534_v23, %v535_v31  ;;  %v544_v40 = vrot.slane %v543_v32, 2  ;;  %v550_v41 = vmax.f32 %v548_v25, %v549_v33  ;;  %v1750_v23 = vld [vmem:[%s2125_s5] sm:$0xff]   ;;  %v1752_v25 = vld [vmem:[%s2125_s5 + $0x8] sm:$0xff]   ;;  %v1754_v27 = vld [vmem:[%s2125_s5 + $0x10] sm:$0xff]  }
 0x10a   : > { %v511_v42 = vrot.slane %v510_v35, 1  ;;  %v518_v43 = vrot.slane %v517_v36, 1  ;;  %v524_v44 = vmax.f32 %v522_v29, %v523_v37  ;;  %v505_v49 = vmax.f32 %v503_v26, %v504_v34  ;;  %v1753_v26 = vld [vmem:[%s2125_s5 + $0x50] sm:$0xff]   ;;  %v1755_v28 = vld [vmem:[%s2125_s5 + $0x58] sm:$0xff]   ;;  %v1758_v31 = vld [vmem:[%s2125_s5 + $0x20] sm:$0xff]  }
 0x10b   : > { %v531_v45 = vmax.f32 %v529_v30, %v530_v38  ;;  %v537_v46 = vrot.slane %v536_v39, 2  ;;  %v545_v47 = vmax.f32 %v543_v32, %v544_v40  ;;  %v551_v48 = vrot.slane %v550_v41, 2  ;;  %v1756_v29 = vld [vmem:[%s2125_s5 + $0x18] sm:$0xff]   ;;  %v1757_v30 = vld [vmem:[%s2125_s5 + $0x60] sm:$0xff]   ;;  %v1759_v32 = vld [vmem:[%s2125_s5 + $0x68] sm:$0xff]  }
 0x10c   : > { %v512_v50 = vmax.f32 %v510_v35, %v511_v42  ;;  %v519_v51 = vmax.f32 %v517_v36, %v518_v43  ;;  %v525_v52 = vrot.slane %v524_v44, 1  ;;  %v1760_v33 = vld [vmem:[%s2125_s5 + $0x28] sm:$0xff]   ;;  %v1761_v34 = vld [vmem:[%s2125_s5 + $0x70] sm:$0xff]   ;;  %v1763_v36 = vld [vmem:[%s2125_s5 + $0x78] sm:$0xff]  }
 0x10d   : > { %v532_v53 = vrot.slane %v531_v45, 1  ;;  %v538_v54 = vmax.f32 %v536_v39, %v537_v46  ;;  %v552_v56 = vmax.f32 %v550_v41, %v551_v48  ;;  %v546_v59 = vrot.slane %v545_v47, 1  ;;  %v1762_v35 = vld [vmem:[%s2125_s5 + $0x30] sm:$0xff]   ;;  %v1764_v37 = vld [vmem:[%s2125_s5 + $0x38] sm:$0xff]   ;;  %v1455_v48 = vld [vmem:[%s2124_s4] ss:$0 sm:$0xff] }
 0x10e   : > { %v526_v57 = vmax.f32 %v524_v44, %v525_v52  ;;  %v566_v58 = vsel %vm565_vm4, %v512_v50, %v505_v49 }
 0x10f   : > { %v568_v60 = vsel %vm567_vm5, %v519_v51, %v566_v58  ;;  %v533_v61 = vmax.f32 %v531_v45, %v532_v53  ;;  %v539_v62 = vrot.slane %v538_v54, 1  ;;  %v553_v63 = vrot.slane %v552_v56, 1 }
 0x110   : > { %v570_v0 = vsel %vm569_vm6, %v526_v57, %v568_v60  ;;  %v547_v4 = vmax.f32 %v545_v47, %v546_v59 }
 0x111   : > { %v540_v1 = vmax.f32 %v538_v54, %v539_v62  ;;  %v572_v3 = vsel %vm571_vm7, %v533_v61, %v570_v0  ;;  %v554_v5 = vmax.f32 %v552_v56, %v553_v63 }
 0x113   : > { %v574_v6 = vsel %vm573_vm8, %v540_v1, %v572_v3 }
 0x114   : > { %v576_v7 = vsel %vm575_vm9, %v547_v4, %v574_v6 }
 0x115   : > { %v578_v8 = vsel %vm577_vm10, %v554_v5, %v576_v7 }
 0x116   : > { %580 = vst [vmem:[#allocation2 + $0x1] sm:$0xff] %v578_v8  ;;  %v600_v10 = vpack.c.bf16 %v578_v8, %v578_v8 }
 0x118   : > { %1611 = vmatmul.mubr.bf16.vlgmr.msra.gmra.mrb[4].mxu1 %v600_v10 }
 0x119   : > { %1635 = vmatpush3.bf16.msra.mxu1 %v1741_v9  ;;  %1650 = vmatprep.mubr.msk.bf16.mxu1 %vm1782_vm2, %v1781_v2 }
 0x11a   : > { %1636 = vmatprep.subr.bf16.mxu1 %v1781_v2 }
 0x11d   : > { %v581_v12 = vld [vmem:[#allocation2] sm:$0xff]  ;;  %1637 = vmatpush3.bf16.msra.mxu1 %v1742_v11 }
 0x11e   : > { %v794_v14 = vld [vmem:[#allocation2 + $0x2] sm:$0xff]  ;;  %v582_v15 = vpack.c.bf16 %v581_v12, %v581_v12  ;;  %961 = vst [vmem:[#allocation2] sm:$0x1] %v1781_v2  ;;  %1638 = vmatprep.subr.bf16.mxu1 %v1781_v2 }
 0x11f   : > { %962 = vst [vmem:[#allocation2 + $0x5] sm:$0x1] %v1781_v2  ;;  %v795_v21 = vpack.c.bf16 %v794_v14, %v794_v14 }
 0x120   : > { %1631 = vmatmul.mubr.bf16.vlgmr.msra.gmra.mrb[8].mxu0 %v582_v15 }
 0x121   : > { %1639 = vmatpush3.bf16.msra.mxu1 %v1743_v13  ;;  %1670 = vmatprep.mubr.msk.bf16.mxu0 %vm1782_vm2, %v1781_v2 }
 0x122   : > { %1640 = vmatprep.subr.bf16.mxu1 %v1781_v2  ;;  %1655 = vmatpush3.bf16.msra.mxu0 %v1749_v22 }
 0x123   : > { %1656 = vmatprep.subr.bf16.mxu0 %v1781_v2 }
 0x125   : > { %1641 = vmatpush3.bf16.msra.mxu1 %v1744_v16 }
 0x126   : > { %1642 = vmatprep.subr.bf16.mxu1 %v1781_v2  ;;  %1657 = vmatpush3.bf16.msra.mxu0 %v1751_v24 }
 0x127   : > { %1658 = vmatprep.subr.bf16.mxu0 %v1781_v2 }
 0x129   : > { %1643 = vmatpush3.bf16.msra.mxu1 %v1745_v17 }
 0x12a   : > { %1644 = vmatprep.subr.bf16.mxu1 %v1781_v2  ;;  %1659 = vmatpush3.bf16.msra.mxu0 %v1753_v26 }
 0x12b   : > { %1660 = vmatprep.subr.bf16.mxu0 %v1781_v2 }
 0x12d   : > { %1645 = vmatpush3.bf16.msra.mxu1 %v1746_v18 }
 0x12e   : > { %1646 = vmatprep.subr.bf16.mxu1 %v1781_v2  ;;  %1661 = vmatpush3.bf16.msra.mxu0 %v1755_v28 }
 0x12f   : > { %1662 = vmatprep.subr.bf16.mxu0 %v1781_v2 }
 0x131   : > { %1647 = vmatpush3.bf16.msra.mxu1 %v1747_v19 }
 0x132   : > { %1648 = vmatprep.subr.bf16.mxu1 %v1781_v2  ;;  %1663 = vmatpush3.bf16.msra.mxu0 %v1757_v30 }
 0x133   : > { %1664 = vmatprep.subr.bf16.mxu0 %v1781_v2 }
 0x135   : > { %1649 = vmatpush3.bf16.msra.mxu1 %v1748_v20 }
 0x136   : > { %1674 = vmatprep.subr.bf16.mxu1 %v1781_v2  ;;  %1665 = vmatpush3.bf16.msra.mxu0 %v1759_v32 }
 0x137   : > { %1666 = vmatprep.subr.bf16.mxu0 %v1781_v2 }
 0x138   : > { %1651 = vmatmul.mubr.bf16.vlgmr.msra.gmra.mrb[8].mxu1 %v795_v21 }
 0x139   : > { %1690 = vmatprep.mubr.msk.bf16.mxu1 %vm1782_vm2, %v1781_v2  ;;  %1675 = vmatpush3.bf16.msra.mxu1 %v1750_v23 }
 0x13a   : > { %1676 = vmatprep.subr.bf16.mxu1 %v1781_v2  ;;  %1667 = vmatpush3.bf16.msra.mxu0 %v1761_v34  ;;  %v1766_v34 = vld [vmem:[%s2125_s5 + $0x88] sm:$0xff]  }
 0x13b   : > { %1668 = vmatprep.subr.bf16.mxu0 %v1781_v2 }
 0x13d   : > { %1677 = vmatpush3.bf16.msra.mxu1 %v1752_v25 }
 0x13e   : > { %1678 = vmatprep.subr.bf16.mxu1 %v1781_v2  ;;  %1669 = vmatpush3.bf16.msra.mxu0 %v1763_v36  ;;  %v1768_v36 = vld [vmem:[%s2125_s5 + $0x98] sm:$0xff]  }
 0x13f   : > { %1694 = vmatprep.subr.bf16.mxu0 %v1781_v2 }
 0x141   : > { %1679 = vmatpush3.bf16.msra.mxu1 %v1754_v27 }
 0x142   : > { %1680 = vmatprep.subr.bf16.mxu1 %v1781_v2 }
 0x145   : > { %1681 = vmatpush3.bf16.msra.mxu1 %v1756_v29 }
 0x146   : > { %1682 = vmatprep.subr.bf16.mxu1 %v1781_v2 }
 0x149   : > { %1683 = vmatpush3.bf16.msra.mxu1 %v1758_v31  ;;  %v1765_v31 = vld [vmem:[%s2125_s5 + $0x80] sm:$0xff]  }
 0x14a   : > { %1684 = vmatprep.subr.bf16.mxu1 %v1781_v2 }
 0x14d   : > { %1685 = vmatpush3.bf16.msra.mxu1 %v1760_v33 }
 0x14e   : > { %1686 = vmatprep.subr.bf16.mxu1 %v1781_v2 }
 0x151   : > { %1687 = vmatpush3.bf16.msra.mxu1 %v1762_v35  ;;  %v1767_v35 = vld [vmem:[%s2125_s5 + $0x90] sm:$0xff]  }
 0x152   : > { %1688 = vmatprep.subr.bf16.mxu1 %v1781_v2 }
 0x155   : > { %1689 = vmatpush3.bf16.msra.mxu1 %v1764_v37  ;;  %v1769_v37 = vld [vmem:[%s2125_s5 + $0xa0] sm:$0xff]  }
 0x1eb   : > { %v700_v38 = vpop.f32.mrb[4].mxu1 }
 0x1ec   : > { %v1612_v39 = vpop.f32.mrb[5].mxu1 }
 0x1ed   : > { %v703_v40 = vpop.f32.mrb[6].mxu1  ;;  %v1771_v39 = vld [vmem:[%s2125_s5 + $0xb0] sm:$0xff]  }
 0x1ee   : > { %v1613_v41 = vpop.f32.mrb[7].mxu1  ;;  %v1772_v40 = vld [vmem:[%s2125_s5 + $0xb8] sm:$0xff]  }
 0x1f3   : > { %v788_v42 = vpop.f32.mrb[8].mxu0 }
 0x1f4   : > { %v789_v43 = vadd.f32 %v788_v42, %v700_v38  ;;  %v1632_v44 = vpop.f32.mrb[9].mxu0  ;;  %v1770_v38 = vld [vmem:[%s2125_s5 + $0xa8] sm:$0xff]  }
 0x1f5   : > { %v791_v45 = vpop.f32.mrb[10].mxu0 }
 0x1f6   : > { %v1633_v46 = vpop.f32.mrb[11].mxu0 }
 0x20b   : > { %v895_v47 = vpop.f32.mrb[8].mxu1 }
 0x20c   : > { %v901_v49 = vadd.f32 %v895_v47, %v789_v43  ;;  %v1652_v50 = vpop.f32.mrb[9].mxu1 }
 0x20d   : > { %v898_v51 = vpop.f32.mrb[10].mxu1 }
 0x20e   : > { %v909_v52 = vadd.f32 %v1455_v48, %v901_v49  ;;  %v1653_v53 = vpop.f32.mrb[11].mxu1 }
 0x20f   : > { %v1512_v53 = vld [vmem:[%s2126_s6] ss:$0 sm:$0xff] }
 0x210   : > { %v910_v54 = vmax.f32 %v909_v52, 0.0 }
 0x212   : > { %v912_v56 = vcombine.high %v910_v54, %v910_v54  ;;  %v919_v57 = vrot.slane %v910_v54, %v1941_v55 }
 0x214   : > { %v926_v58 = vrot.slane %v912_v56, %v1941_v55  ;;  %v927_v59 = vcombine.high %v919_v57, %v919_v57  ;;  %v933_v60 = vsel %vm298_vm0, %v919_v57, -inf }
 0x215   : > { %v934_v61 = vrot.slane %v933_v60, 4 }
 0x216   : > { %v928_v62 = vcombine.high %v926_v58, %v926_v58  ;;  %v940_v63 = vsel %vm298_vm0, %v927_v59, -inf  ;;  %v947_v0 = vsel %vm298_vm0, %v926_v58, -inf }
 0x217   : > { %v935_v1 = vmax.f32 %v933_v60, %v934_v61  ;;  %v941_v3 = vrot.slane %v940_v63, 4  ;;  %v948_v4 = vrot.slane %v947_v0, 4 }
 0x218   : > { %v954_v5 = vsel %vm298_vm0, %v928_v62, -inf }
 0x219   : > { %v936_v6 = vrot.slane %v935_v1, 2  ;;  %v942_v7 = vmax.f32 %v940_v63, %v941_v3  ;;  %v949_v8 = vmax.f32 %v947_v0, %v948_v4  ;;  %v955_v9 = vrot.slane %v954_v5, 4 }
 0x21b   : > { %v937_v10 = vmax.f32 %v935_v1, %v936_v6  ;;  %v943_v11 = vrot.slane %v942_v7, 2  ;;  %v950_v12 = vrot.slane %v949_v8, 2  ;;  %v956_v13 = vmax.f32 %v954_v5, %v955_v9 }
 0x21d   : > { %v938_v14 = vrot.slane %v937_v10, 1  ;;  %v944_v15 = vmax.f32 %v942_v7, %v943_v11  ;;  %v951_v16 = vmax.f32 %v949_v8, %v950_v12  ;;  %v957_v17 = vrot.slane %v956_v13, 2 }
 0x21f   : > { %v945_v18 = vrot.slane %v944_v15, 1  ;;  %v952_v19 = vrot.slane %v951_v16, 1  ;;  %v958_v20 = vmax.f32 %v956_v13, %v957_v17  ;;  %v939_v21 = vmax.f32 %v937_v10, %v938_v14 }
 0x221   : > { %v946_v22 = vmax.f32 %v944_v15, %v945_v18  ;;  %v953_v23 = vmax.f32 %v951_v16, %v952_v19  ;;  %v959_v24 = vrot.slane %v958_v20, 1 }
 0x223   : > { %v960_v25 = vmax.f32 %v958_v20, %v959_v24  ;;  %v967_v26 = vsel %vm565_vm4, %v946_v22, %v939_v21 }
 0x224   : > { %v968_v27 = vsel %vm567_vm5, %v953_v23, %v967_v26 }
 0x225   : > { %v969_v28 = vsel %vm569_vm6, %v960_v25, %v968_v27 }
 0x226   : > { %971 = vst [vmem:[#allocation2 + $0x1] sm:$0xf] %v969_v28 }
 0x22d   : > { %v990_v29 = vld [vmem:[#allocation2 + $0x1] sm:$0xf] }
 0x22e   : > { %v972_v30 = vld [vmem:[#allocation2] sm:$0xf]  ;;  %v991_v32 = vpack.c.bf16 %v990_v29, %v990_v29 }
 0x22f   : > { %v973_v33 = vpack.c.bf16 %v972_v30, %v972_v30  ;;  %v1185_v41 = vld [vmem:[#allocation2 + $0x2] sm:$0xf] }
 0x230   : > { %1671 = vmatmul.mubr.bf16.vlgmr.msra.gmra.mrb[12].mxu0 %v991_v32  ;;  %v1186_v42 = vpack.c.bf16 %v1185_v41, %v1185_v41 }
 0x231   : > { %1691 = vmatmul.mubr.bf16.vlgmr.msra.gmra.mrb[12].mxu1 %v973_v33  ;;  %1695 = vmatpush3.bf16.msra.mxu0 %v1765_v31 }
 0x232   : > { %1710 = vmatprep.mubr.msk.bf16.mxu0 %vm1782_vm2, %v1781_v2  ;;  %1696 = vmatprep.subr.bf16.mxu0 %v1781_v2 }
 0x235   : > { %1697 = vmatpush3.bf16.msra.mxu0 %v1766_v34 }
 0x236   : > { %1698 = vmatprep.subr.bf16.mxu0 %v1781_v2 }
 0x239   : > { %1699 = vmatpush3.bf16.msra.mxu0 %v1767_v35 }
 0x23a   : > { %1700 = vmatprep.subr.bf16.mxu0 %v1781_v2 }
 0x23d   : > { %1701 = vmatpush3.bf16.msra.mxu0 %v1768_v36 }
 0x23e   : > { %1702 = vmatprep.subr.bf16.mxu0 %v1781_v2 }
 0x241   : > { %1703 = vmatpush3.bf16.msra.mxu0 %v1769_v37 }
 0x242   : > { %1704 = vmatprep.subr.bf16.mxu0 %v1781_v2 }
 0x245   : > { %1705 = vmatpush3.bf16.msra.mxu0 %v1770_v38 }
 0x246   : > { %1706 = vmatprep.subr.bf16.mxu0 %v1781_v2 }
 0x249   : > { %1707 = vmatpush3.bf16.msra.mxu0 %v1771_v39 }
 0x24a   : > { %1708 = vmatprep.subr.bf16.mxu0 %v1781_v2 }
 0x24d   : > { %1709 = vmatpush3.bf16.msra.mxu0 %v1772_v40 }
 0x250   : > { %1711 = vmatmul.mubr.bf16.vlgmr.msra.gmra.mrb[16].mxu0 %v1186_v42 }
 0x303   : > { %v1091_v43 = vpop.f32.mrb[12].mxu0 }
 0x304   : > { %v1179_v44 = vpop.f32.mrb[12].mxu1  ;;  %v1672_v46 = vpop.f32.mrb[13].mxu0 }
 0x305   : > { %v1180_v45 = vadd.f32 %v1179_v44, %v1091_v43  ;;  %v1692_v47 = vpop.f32.mrb[13].mxu1  ;;  %v1094_v48 = vpop.f32.mrb[14].mxu0 }
 0x306   : > { %v1182_v49 = vpop.f32.mrb[14].mxu1  ;;  %v1673_v50 = vpop.f32.mrb[15].mxu0 }
 0x307   : > { %v1693_v51 = vpop.f32.mrb[15].mxu1 }
 0x323   : > { %v1286_v52 = vpop.f32.mrb[16].mxu0 }
 0x324   : > { %v1292_v54 = vadd.f32 %v1286_v52, %v1180_v45  ;;  %v1712_v2 = vpop.f32.mrb[17].mxu0 }
 0x325   : > { %v1289_v56 = vpop.f32.mrb[18].mxu0 }
 0x326   : > { %v1300_v57 = vadd.f32 %v1512_v53, %v1292_v54  ;;  %v1713_v58 = vpop.f32.mrb[19].mxu0 }
 0x328   : > { %v1301_v59 = vmax.f32 %v1300_v57, 0.0 }
 0x32a   : > { %v1309_v60 = vrot.slane %v1301_v59, %v1941_v55 }
 0x32c   : > { %v1310_v61 = vcombine.high %v1309_v60, %v1309_v60  ;;  %v1313_v62 = vsel %vm298_vm0, %v1309_v60, -inf }
 0x32d   : > { %v1314_v63 = vrot.slane %v1313_v62, 4 }
 0x32e   : > { %v1320_v0 = vsel %vm298_vm0, %v1310_v61, -inf }
 0x32f   : > { %v1315_v1 = vmax.f32 %v1313_v62, %v1314_v63  ;;  %v1321_v3 = vrot.slane %v1320_v0, 4 }
 0x331   : > { %v1316_v4 = vrot.slane %v1315_v1, 2  ;;  %v1322_v5 = vmax.f32 %v1320_v0, %v1321_v3 }
 0x333   : > { %v1317_v6 = vmax.f32 %v1315_v1, %v1316_v4  ;;  %v1323_v7 = vrot.slane %v1322_v5, 2 }
 0x335   : > { %v1318_v8 = vrot.slane %v1317_v6, 1  ;;  %v1324_v9 = vmax.f32 %v1322_v5, %v1323_v7 }
 0x337   : > { %v1325_v10 = vrot.slane %v1324_v9, 1  ;;  %v1319_v55 = vmax.f32 %v1317_v6, %v1318_v8 }
 0x339   : > { %v1326_v11 = vmax.f32 %v1324_v9, %v1325_v10 }
 0x33b   : > { %v1329_v12 = vsel %vm565_vm4, %v1326_v11, %v1319_v55 }
 0x33c   : > { %1331 = vst [vmem:[%s276_s13] sm:$0x3] %v1329_v12 }
 0x33d PF: > { %s17_s24 = sadd.s32 1, %s1779_s24  }
 0x33e   : > { %p14_p4 = scmp.ge.s32.totalorder %s17_s24, 4  }
 0x340   :  { %16 = sbr.rel (!%p14_p4) target bundleno = 1 (0x1), region = 84 }

</bundles_post_ra>
